<compile_context>
chip_gen: v6e
topology: v6e:2x2x1
jax: 0.10.0
libtpu: 0.0.40
codegen_flags: <defaults>
</compile_context>

<pallas_src>
import functools

import jax
import jax.numpy as jnp
from jax import lax
from jax.experimental import pallas as pl
from jax.experimental.pallas import tpu as pltpu

_LN_EPS = 1e-5


def _gelu(x, approx):
    if approx:
        # tanh-approximate GELU: routed to the EUP (otherwise-idle bundle slot).
        return jax.nn.gelu(x, approximate=True)
    # nn.GELU() default = exact erf formulation.
    return 0.5 * x * (1.0 + lax.erf(x * jnp.float32(0.7071067811865476)))


def crossmapper_kernel(*refs, h2, fused, approx_gelu):
    """refs = (x, w1, b1, [w2s, b2s | w2, b2, ws, bs], g, beta, wb, bb, wo, bo, out)."""
    out_ref = refs[-1]
    if fused:
        (x_ref, w1_ref, b1_ref, w2s_ref, b2s_ref,
         g_ref, beta_ref, wb_ref, bb_ref, wo_ref, bo_ref) = refs[:-1]
    else:
        (x_ref, w1_ref, b1_ref, w2_ref, b2_ref, ws_ref, bs_ref,
         g_ref, beta_ref, wb_ref, bb_ref, wo_ref, bo_ref) = refs[:-1]

    cdt = w1_ref.dtype  # matmul operand dtype (bf16 fast path / f32 exact path)
    dot = functools.partial(jnp.dot, preferred_element_type=jnp.float32)

    # fc1 + GELU (dropout = identity at inference); x already in compute dtype.
    x1 = _gelu(dot(x_ref[...], w1_ref[...]) + b1_ref[...], approx_gelu)
    x1c = x1.astype(cdt)

    if fused:
        # Fused fc2 | shortcut: one [T, H1] x [H1, 2*H2] matmul, split on a
        # 128-lane boundary (guaranteed by the wrapper).
        h = dot(x1c, w2s_ref[...]) + b2s_ref[...]
        x2 = h[:, :h2]        # fc2 branch  -> LayerNorm
        x1p = h[:, h2:]       # shortcut projection of x1
    else:
        x2 = dot(x1c, w2_ref[...]) + b2_ref[...]
        x1p = dot(x1c, ws_ref[...]) + bs_ref[...]

    # LayerNorm (two-pass biased variance), eps = 1e-5.
    mean = jnp.mean(x2, axis=-1, keepdims=True)
    cent = x2 - mean
    var = jnp.mean(cent * cent, axis=-1, keepdims=True)
    x2 = cent * lax.rsqrt(var + _LN_EPS) * g_ref[...] + beta_ref[...]

    # residual + relu
    x2 = jnp.maximum(x2 + x1p, 0.0)

    # bottleneck + relu (dropout = identity at inference)
    x3 = jnp.maximum(dot(x2.astype(cdt), wb_ref[...]) + bb_ref[...], 0.0)

    # output + sigmoid (output lane dim is padded to 128 -> unmasked stores)
    out = dot(x3.astype(cdt), wo_ref[...]) + bo_ref[...]
    out_ref[...] = jax.nn.sigmoid(out).astype(out_ref.dtype)


def _round_up(x, m):
    return ((x + m - 1) // m) * m


def _vmem_capacity_bytes():
    try:
        return int(pltpu.get_tpu_info().vmem_capacity_bytes)
    except Exception:
        return 64 * 1024 * 1024  # v7x per-TensorCore VMEM, the smallest current gen


def crossmapper_forward(x, params, *, tile_b=None,
                        compute_dtype=jnp.bfloat16, approx_gelu=True):
    """x: [B, Din] float32. params: dict of weights (see init_params).

    Default is the production fast path (bf16 MXU operands with f32
    accumulation + tanh GELU; NOT bit-faithful to PyTorch, ~1e-2 level).
    Use compute_dtype=jnp.float32, approx_gelu=False for the f32/erf path.
    """
    B, Din = x.shape
    H1 = params["w1"].shape[1]
    H2 = params["w2"].shape[1]
    Dout = params["wo"].shape[1]
    Doutp = _round_up(Dout, 128)      # lane-dense output stores + full MXU N fill

    cdt = jnp.dtype(compute_dtype)
    x_it = cdt.itemsize
    sub = 16 if x_it == 2 else 8      # sublane packing granularity for x tiles

    # Only fuse fc2|shortcut when the split point is a vreg lane boundary.
    fused = (H2 % 128) == 0

    # --- operand packing: weights cast to compute dtype; x cast here so its
    #     HBM->VMEM stream is already bf16 on the fast path.  Biases / LN
    #     params stay f32 (added post-accumulation).
    x_cast = x.astype(cdt)
    w1 = params["w1"].astype(cdt)
    b1 = params["b1"]
    if fused:
        mid_ops = (jnp.concatenate([params["w2"], params["ws"]], axis=1).astype(cdt),
                   jnp.concatenate([params["b2"], params["bs"]], axis=1))
        mid_shapes = ((H1, 2 * H2), (1, 2 * H2))
    else:
        mid_ops = (params["w2"].astype(cdt), params["b2"],
                   params["ws"].astype(cdt), params["bs"])
        mid_shapes = ((H1, H2), (1, H2), (H1, H2), (1, H2))
    ln_g, ln_b = params["ln_g"], params["ln_b"]
    wb = params["wb"].astype(cdt)
    bb = params["bb"]
    wo = jnp.pad(params["wo"], ((0, 0), (0, Doutp - Dout))).astype(cdt)
    bo = jnp.pad(params["bo"], ((0, 0), (0, Doutp - Dout)))

    weight_ops = (w1, b1) + mid_ops + (ln_g, ln_b, wb, bb, wo, bo)
    weight_shapes = ((Din, H1), (1, H1)) + mid_shapes + \
        ((1, H2), (1, H2), (H2, H1), (1, H1), (H1, Doutp), (1, Doutp))
    weight_bytes = sum(int(a.size) * a.dtype.itemsize for a in weight_ops)

    # --- VMEM-aware batch-tile choice (generation aware: 64 MiB v7x, 128 MiB
    #     v5e/v6e).  Big tiles amortize the ~0.35us per-grid-step overhead.
    vmem_cap = _vmem_capacity_bytes()
    vmem_limit = int(min(vmem_cap * 0.7, 100 * 1024 * 1024))
    if tile_b is None:
        budget = int(vmem_limit * 0.75) - 2 * weight_bytes   # worst-case 2 bufs/weight
        per_row = (2 * Din * x_it                 # double-buffered x block
                   + 2 * Doutp * 4                # double-buffered out block
                   + 4 * (H1 + 2 * H2 + H2 + H1 + Doutp)   # live f32 intermediates
                   + x_it * (H1 + H2 + H1))       # compute-dtype copies feeding MXU
        tile_b = max(sub, budget // max(per_row, 1))
        tile_b = min(tile_b, 2048, _round_up(B, sub))
        # Keep >= 2 grid steps when the batch allows, so the "parallel" batch
        # axis can be sharded across both v7x TensorCores (harmless elsewhere).
        if B >= 2 * sub:
            tile_b = min(tile_b, _round_up(-(-B // 2), sub))
    tile_b = max(sub, _round_up(int(tile_b), sub))

    # --- pad batch so any B works; padded rows are discarded afterwards.
    Bp = _round_up(B, tile_b)
    xp = x_cast if Bp == B else jnp.pad(x_cast, ((0, Bp - B), (0, 0)))
    grid = (Bp // tile_b,)

    flops = 2 * Bp * (Din * H1 + H1 * 2 * H2 + H2 * H1 + H1 * Doutp)
    transcendentals = Bp * (H1 + Doutp + 1)
    # weights counted once (VMEM-resident); x/out streamed per batch row.
    bytes_accessed = Bp * Din * x_it + Bp * Doutp * 4 + weight_bytes

    kernel = functools.partial(crossmapper_kernel, h2=H2, fused=fused,
                               approx_gelu=approx_gelu)

    def call(single_buffer_weights):
        mode = pl.Buffered(1) if single_buffer_weights else None

        def rep(shape):
            # Full-array block, same block every grid step (VMEM-resident).
            if mode is None:
                return pl.BlockSpec(shape, lambda i: (0, 0))
            return pl.BlockSpec(shape, lambda i: (0, 0), pipeline_mode=mode)

        in_specs = [pl.BlockSpec((tile_b, Din), lambda i: (i, 0))]   # x, batch-tiled
        in_specs += [rep(s) for s in weight_shapes]
        out_spec = pl.BlockSpec((tile_b, Doutp), lambda i: (i, 0))

        return pl.pallas_call(
            kernel,
            out_shape=jax.ShapeDtypeStruct((Bp, Doutp), jnp.float32),
            grid=grid,
            in_specs=in_specs,
            out_specs=out_spec,
            compiler_params=pltpu.CompilerParams(
                dimension_semantics=("parallel",),
                vmem_limit_bytes=vmem_limit,
            ),
            cost_estimate=pl.CostEstimate(
                flops=int(flops),
                transcendentals=int(transcendentals),
                bytes_accessed=int(bytes_accessed),
            ),
        )(xp, *weight_ops)

    try:
        out = call(True)    # single-buffered resident weights (halves their VMEM)
    except Exception:
        out = call(False)   # fall back if this jax build rejects Buffered(1)

    return out[:B, :Dout]


def init_params(key, input_dim, output_dim, hidden_factor=4):
    h1 = input_dim * 2
    h2 = input_dim * hidden_factor

    def linear(k, fan_in, fan_out):
        kw, kb = jax.random.split(k)
        bound = 1.0 / jnp.sqrt(fan_in)
        w = jax.random.uniform(kw, (fan_in, fan_out), jnp.float32, -bound, bound)
        b = jax.random.uniform(kb, (1, fan_out), jnp.float32, -bound, bound)
        return w, b

    k1, k2, k3, k4, k5 = jax.random.split(key, 5)
    w1, b1 = linear(k1, input_dim, h1)
    w2, b2 = linear(k2, h1, h2)
    ws, bs = linear(k3, h1, h2)
    wb, bb = linear(k4, h2, h1)
    wo, bo = linear(k5, h1, output_dim)
    return {
        "w1": w1, "b1": b1,
        "w2": w2, "b2": b2,
        "ln_g": jnp.ones((1, h2), jnp.float32),
        "ln_b": jnp.zeros((1, h2), jnp.float32),
        "ws": ws, "bs": bs,
        "wb": wb, "bb": bb,
        "wo": wo, "bo": bo,
    }


def reference_forward(x, p):
    """Pure-JAX reference (inference-mode PyTorch semantics, f32 + erf GELU)."""
    dot = functools.partial(jnp.dot, precision="highest")
    x1 = _gelu(dot(x, p["w1"]) + p["b1"], approx=False)
    x2 = dot(x1, p["w2"]) + p["b2"]
    mean = jnp.mean(x2, axis=-1, keepdims=True)
    var = jnp.mean((x2 - mean) ** 2, axis=-1, keepdims=True)
    x2 = (x2 - mean) * lax.rsqrt(var + _LN_EPS) * p["ln_g"] + p["ln_b"]
    x1 = dot(x1, p["ws"]) + p["bs"]
    x2 = jnp.maximum(x2 + x1, 0.0)
    x3 = jnp.maximum(dot(x2, p["wb"]) + p["bb"], 0.0)
    return jax.nn.sigmoid(dot(x3, p["wo"]) + p["bo"])


if __name__ == "__main__":
    key = jax.random.PRNGKey(0)
    kx, kp = jax.random.split(key)

    batch = 8
    input_dim = 32     # -> h1 = 64, h2 = 128
    output_dim = 16

    x = jax.random.normal(kx, (batch, input_dim), jnp.float32)
    params = init_params(kp, input_dim, output_dim)
    ref = reference_forward(x, params)

    # 1) Production fast path: bf16 MXU operands (f32 accumulation) + tanh GELU.
    out_fast = jax.block_until_ready(crossmapper_forward(x, params))
    assert out_fast.shape == (batch, output_dim)
    assert jnp.allclose(out_fast, ref, atol=2e-2, rtol=2e-2), "fast path mismatch"

    # 2) Validation path: f32 matmul operands + exact (erf) GELU.
    out_exact = jax.block_until_ready(
        crossmapper_forward(x, params, compute_dtype=jnp.float32, approx_gelu=False)
    )
    assert out_exact.shape == (batch, output_dim)
    assert jnp.allclose(out_exact, ref, atol=5e-3, rtol=5e-3), "f32 path mismatch"

    # 3) Padding path: batch not divisible by tile_b, grid > 1.
    x10 = jax.random.normal(kx, (10, input_dim), jnp.float32)
    out_pad = jax.block_until_ready(
        crossmapper_forward(x10, params, tile_b=8,
                            compute_dtype=jnp.float32, approx_gelu=False)
    )
    assert out_pad.shape == (10, output_dim)
    assert jnp.allclose(out_pad, reference_forward(x10, params),
                        atol=5e-3, rtol=5e-3), "padded-batch mismatch"

    print("KERNEL_OK")
</pallas_src>

<mosaic_0001>
module attributes {stable_mosaic.version = 11 : i64} {
  func.func @crossmapper_kernel(%arg0: i32, %arg1: memref<16x32xbf16, #tpu.memory_space<vmem>>, %arg2: memref<32x64xbf16, #tpu.memory_space<vmem>>, %arg3: memref<1x64xf32, #tpu.memory_space<vmem>>, %arg4: memref<64x256xbf16, #tpu.memory_space<vmem>>, %arg5: memref<1x256xf32, #tpu.memory_space<vmem>>, %arg6: memref<1x128xf32, #tpu.memory_space<vmem>>, %arg7: memref<1x128xf32, #tpu.memory_space<vmem>>, %arg8: memref<128x64xbf16, #tpu.memory_space<vmem>>, %arg9: memref<1x64xf32, #tpu.memory_space<vmem>>, %arg10: memref<64x128xbf16, #tpu.memory_space<vmem>>, %arg11: memref<1x128xf32, #tpu.memory_space<vmem>>, %arg12: memref<16x128xf32, #tpu.memory_space<vmem>>) attributes {dimension_semantics = [#tpu.dimension_semantics<parallel>], iteration_bounds = array<i64: 1>, scalar_prefetch = 0 : i64, scratch_operands = 0 : i64, tpu.core_type = #tpu.core_type<tc>, window_params = [{transform_indices = @transform_0, window_bounds = array<i64: 16, 32>}, {pipeline_mode = #tpu.pipeline_mode<synchronous>, transform_indices = @transform_1, window_bounds = array<i64: 32, 64>}, {pipeline_mode = #tpu.pipeline_mode<synchronous>, transform_indices = @transform_2, window_bounds = array<i64: 1, 64>}, {pipeline_mode = #tpu.pipeline_mode<synchronous>, transform_indices = @transform_3, window_bounds = array<i64: 64, 256>}, {pipeline_mode = #tpu.pipeline_mode<synchronous>, transform_indices = @transform_4, window_bounds = array<i64: 1, 256>}, {pipeline_mode = #tpu.pipeline_mode<synchronous>, transform_indices = @transform_5, window_bounds = array<i64: 1, 128>}, {pipeline_mode = #tpu.pipeline_mode<synchronous>, transform_indices = @transform_6, window_bounds = array<i64: 1, 128>}, {pipeline_mode = #tpu.pipeline_mode<synchronous>, transform_indices = @transform_7, window_bounds = array<i64: 128, 64>}, {pipeline_mode = #tpu.pipeline_mode<synchronous>, transform_indices = @transform_8, window_bounds = array<i64: 1, 64>}, {pipeline_mode = #tpu.pipeline_mode<synchronous>, transform_indices = @transform_9, window_bounds = array<i64: 64, 128>}, {pipeline_mode = #tpu.pipeline_mode<synchronous>, transform_indices = @transform_10, window_bounds = array<i64: 1, 128>}, {transform_indices = @transform_11, window_bounds = array<i64: 16, 128>}]} {
    %c0 = arith.constant 0 : index
    %c0_0 = arith.constant 0 : index
    %0 = vector.load %arg1[%c0, %c0_0] : memref<16x32xbf16, #tpu.memory_space<vmem>>, vector<16x32xbf16>
    %c0_1 = arith.constant 0 : index
    %c0_2 = arith.constant 0 : index
    %1 = vector.load %arg2[%c0_1, %c0_2] : memref<32x64xbf16, #tpu.memory_space<vmem>>, vector<32x64xbf16>
    %cst = arith.constant dense<0.000000e+00> : vector<16x64xf32>
    %2 = tpu.matmul %0, %1, %cst {dimension_numbers = #tpu.dot_dimension_numbers<[1], [0], [0], [1], [0, 0, 1, 1], [], []>} : vector<16x32xbf16>, vector<32x64xbf16>, vector<16x64xf32> -> vector<16x64xf32>
    %c0_3 = arith.constant 0 : index
    %c0_4 = arith.constant 0 : index
    %3 = vector.load %arg3[%c0_3, %c0_4] : memref<1x64xf32, #tpu.memory_space<vmem>>, vector<1x64xf32>
    %4 = vector.broadcast %3 : vector<1x64xf32> to vector<16x64xf32>
    %5 = arith.addf %2, %4 : vector<16x64xf32>
    %6 = arith.mulf %5, %5 : vector<16x64xf32>
    %7 = arith.mulf %5, %6 : vector<16x64xf32>
    %cst_5 = arith.constant 4.471500e-02 : f32
    %8 = vector.broadcast %cst_5 : f32 to vector<16x64xf32>
    %9 = arith.mulf %8, %7 : vector<16x64xf32>
    %10 = arith.addf %5, %9 : vector<16x64xf32>
    %cst_6 = arith.constant 0.797884583 : f32
    %11 = vector.broadcast %cst_6 : f32 to vector<16x64xf32>
    %12 = arith.mulf %11, %10 : vector<16x64xf32>
    %13 = math.tanh %12 : vector<16x64xf32>
    %cst_7 = arith.constant 1.000000e+00 : f32
    %14 = vector.broadcast %cst_7 : f32 to vector<16x64xf32>
    %15 = arith.addf %14, %13 : vector<16x64xf32>
    %cst_8 = arith.constant 5.000000e-01 : f32
    %16 = vector.broadcast %cst_8 : f32 to vector<16x64xf32>
    %17 = arith.mulf %16, %15 : vector<16x64xf32>
    %18 = arith.mulf %5, %17 : vector<16x64xf32>
    %19 = arith.truncf %18 : vector<16x64xf32> to vector<16x64xbf16>
    %c0_9 = arith.constant 0 : index
    %c0_10 = arith.constant 0 : index
    %20 = vector.load %arg4[%c0_9, %c0_10] : memref<64x256xbf16, #tpu.memory_space<vmem>>, vector<64x256xbf16>
    %cst_11 = arith.constant dense<0.000000e+00> : vector<16x256xf32>
    %21 = tpu.matmul %19, %20, %cst_11 {dimension_numbers = #tpu.dot_dimension_numbers<[1], [0], [0], [1], [0, 0, 1, 1], [], []>} : vector<16x64xbf16>, vector<64x256xbf16>, vector<16x256xf32> -> vector<16x256xf32>
    %c0_12 = arith.constant 0 : index
    %c0_13 = arith.constant 0 : index
    %22 = vector.load %arg5[%c0_12, %c0_13] : memref<1x256xf32, #tpu.memory_space<vmem>>, vector<1x256xf32>
    %23 = vector.broadcast %22 : vector<1x256xf32> to vector<16x256xf32>
    %24 = arith.addf %21, %23 : vector<16x256xf32>
    %25 = vector.extract_strided_slice %24 {offsets = [0, 0], sizes = [16, 128], strides = [1, 1]} : vector<16x256xf32> to vector<16x128xf32>
    %26 = vector.extract_strided_slice %24 {offsets = [0, 128], sizes = [16, 128], strides = [1, 1]} : vector<16x256xf32> to vector<16x128xf32>
    %cst_14 = arith.constant dense<0.000000e+00> : vector<16xf32>
    %27 = vector.multi_reduction <add>, %25, %cst_14 [1] : vector<16x128xf32> to vector<16xf32>
    %28 = vector.shape_cast %27 : vector<16xf32> to vector<16x1xf32>
    %cst_15 = arith.constant 1.280000e+02 : f32
    %29 = vector.broadcast %cst_15 : f32 to vector<16x1xf32>
    %30 = arith.divf %28, %29 : vector<16x1xf32>
    %31 = vector.broadcast %30 : vector<16x1xf32> to vector<16x128xf32>
    %32 = arith.subf %25, %31 : vector<16x128xf32>
    %33 = arith.mulf %32, %32 : vector<16x128xf32>
    %cst_16 = arith.constant dense<0.000000e+00> : vector<16xf32>
    %34 = vector.multi_reduction <add>, %33, %cst_16 [1] : vector<16x128xf32> to vector<16xf32>
    %35 = vector.shape_cast %34 : vector<16xf32> to vector<16x1xf32>
    %cst_17 = arith.constant 1.280000e+02 : f32
    %36 = vector.broadcast %cst_17 : f32 to vector<16x1xf32>
    %37 = arith.divf %35, %36 : vector<16x1xf32>
    %cst_18 = arith.constant 9.99999974E-6 : f32
    %38 = vector.broadcast %cst_18 : f32 to vector<16x1xf32>
    %39 = arith.addf %37, %38 : vector<16x1xf32>
    %40 = math.rsqrt %39 : vector<16x1xf32>
    %41 = vector.broadcast %40 : vector<16x1xf32> to vector<16x128xf32>
    %42 = arith.mulf %32, %41 : vector<16x128xf32>
    %c0_19 = arith.constant 0 : index
    %c0_20 = arith.constant 0 : index
    %43 = vector.load %arg6[%c0_19, %c0_20] : memref<1x128xf32, #tpu.memory_space<vmem>>, vector<1x128xf32>
    %44 = vector.broadcast %43 : vector<1x128xf32> to vector<16x128xf32>
    %45 = arith.mulf %42, %44 : vector<16x128xf32>
    %c0_21 = arith.constant 0 : index
    %c0_22 = arith.constant 0 : index
    %46 = vector.load %arg7[%c0_21, %c0_22] : memref<1x128xf32, #tpu.memory_space<vmem>>, vector<1x128xf32>
    %47 = vector.broadcast %46 : vector<1x128xf32> to vector<16x128xf32>
    %48 = arith.addf %45, %47 : vector<16x128xf32>
    %49 = arith.addf %48, %26 : vector<16x128xf32>
    %cst_23 = arith.constant 0.000000e+00 : f32
    %50 = vector.broadcast %cst_23 : f32 to vector<16x128xf32>
    %51 = arith.maximumf %49, %50 : vector<16x128xf32>
    %52 = arith.truncf %51 : vector<16x128xf32> to vector<16x128xbf16>
    %c0_24 = arith.constant 0 : index
    %c0_25 = arith.constant 0 : index
    %53 = vector.load %arg8[%c0_24, %c0_25] : memref<128x64xbf16, #tpu.memory_space<vmem>>, vector<128x64xbf16>
    %cst_26 = arith.constant dense<0.000000e+00> : vector<16x64xf32>
    %54 = tpu.matmul %52, %53, %cst_26 {dimension_numbers = #tpu.dot_dimension_numbers<[1], [0], [0], [1], [0, 0, 1, 1], [], []>} : vector<16x128xbf16>, vector<128x64xbf16>, vector<16x64xf32> -> vector<16x64xf32>
    %c0_27 = arith.constant 0 : index
    %c0_28 = arith.constant 0 : index
    %55 = vector.load %arg9[%c0_27, %c0_28] : memref<1x64xf32, #tpu.memory_space<vmem>>, vector<1x64xf32>
    %56 = vector.broadcast %55 : vector<1x64xf32> to vector<16x64xf32>
    %57 = arith.addf %54, %56 : vector<16x64xf32>
    %cst_29 = arith.constant 0.000000e+00 : f32
    %58 = vector.broadcast %cst_29 : f32 to vector<16x64xf32>
    %59 = arith.maximumf %57, %58 : vector<16x64xf32>
    %60 = arith.truncf %59 : vector<16x64xf32> to vector<16x64xbf16>
    %c0_30 = arith.constant 0 : index
    %c0_31 = arith.constant 0 : index
    %61 = vector.load %arg10[%c0_30, %c0_31] : memref<64x128xbf16, #tpu.memory_space<vmem>>, vector<64x128xbf16>
    %cst_32 = arith.constant dense<0.000000e+00> : vector<16x128xf32>
    %62 = tpu.matmul %60, %61, %cst_32 {dimension_numbers = #tpu.dot_dimension_numbers<[1], [0], [0], [1], [0, 0, 1, 1], [], []>} : vector<16x64xbf16>, vector<64x128xbf16>, vector<16x128xf32> -> vector<16x128xf32>
    %c0_33 = arith.constant 0 : index
    %c0_34 = arith.constant 0 : index
    %63 = vector.load %arg11[%c0_33, %c0_34] : memref<1x128xf32, #tpu.memory_space<vmem>>, vector<1x128xf32>
    %64 = vector.broadcast %63 : vector<1x128xf32> to vector<16x128xf32>
    %65 = arith.addf %62, %64 : vector<16x128xf32>
    %66 = arith.negf %65 : vector<16x128xf32>
    %67 = math.exp %66 : vector<16x128xf32>
    %cst_35 = arith.constant 1.000000e+00 : f32
    %68 = vector.broadcast %cst_35 : f32 to vector<16x128xf32>
    %69 = arith.addf %68, %67 : vector<16x128xf32>
    %70 = arith.divf %68, %69 : vector<16x128xf32>
    %c0_36 = arith.constant 0 : index
    %c0_37 = arith.constant 0 : index
    %71 = vector.load %arg12[%c0_36, %c0_37] : memref<16x128xf32, #tpu.memory_space<vmem>>, vector<16x128xf32>
    tpu.vector_store %arg12[%c0_36, %c0_37], %70 {strides = array<i32>} : memref<16x128xf32, #tpu.memory_space<vmem>>, vector<16x128xf32>,
    return
  }
  func.func @transform_0(%arg0: i32) -> (i32, i32) {
    %c0_i32 = arith.constant 0 : i32
    %c0_i32_0 = arith.constant 0 : i32
    return %arg0, %c0_i32 : i32, i32
  }
  func.func @transform_1(%arg0: i32) -> (i32, i32) {
    %c0_i32 = arith.constant 0 : i32
    %c0_i32_0 = arith.constant 0 : i32
    %c0_i32_1 = arith.constant 0 : i32
    return %c0_i32, %c0_i32_0 : i32, i32
  }
  func.func @transform_2(%arg0: i32) -> (i32, i32) {
    %c0_i32 = arith.constant 0 : i32
    %c0_i32_0 = arith.constant 0 : i32
    %c0_i32_1 = arith.constant 0 : i32
    return %c0_i32, %c0_i32_0 : i32, i32
  }
  func.func @transform_3(%arg0: i32) -> (i32, i32) {
    %c0_i32 = arith.constant 0 : i32
    %c0_i32_0 = arith.constant 0 : i32
    %c0_i32_1 = arith.constant 0 : i32
    return %c0_i32, %c0_i32_0 : i32, i32
  }
  func.func @transform_4(%arg0: i32) -> (i32, i32) {
    %c0_i32 = arith.constant 0 : i32
    %c0_i32_0 = arith.constant 0 : i32
    %c0_i32_1 = arith.constant 0 : i32
    return %c0_i32, %c0_i32_0 : i32, i32
  }
  func.func @transform_5(%arg0: i32) -> (i32, i32) {
    %c0_i32 = arith.constant 0 : i32
    %c0_i32_0 = arith.constant 0 : i32
    %c0_i32_1 = arith.constant 0 : i32
    return %c0_i32, %c0_i32_0 : i32, i32
  }
  func.func @transform_6(%arg0: i32) -> (i32, i32) {
    %c0_i32 = arith.constant 0 : i32
    %c0_i32_0 = arith.constant 0 : i32
    %c0_i32_1 = arith.constant 0 : i32
    return %c0_i32, %c0_i32_0 : i32, i32
  }
  func.func @transform_7(%arg0: i32) -> (i32, i32) {
    %c0_i32 = arith.constant 0 : i32
    %c0_i32_0 = arith.constant 0 : i32
    %c0_i32_1 = arith.constant 0 : i32
    return %c0_i32, %c0_i32_0 : i32, i32
  }
  func.func @transform_8(%arg0: i32) -> (i32, i32) {
    %c0_i32 = arith.constant 0 : i32
    %c0_i32_0 = arith.constant 0 : i32
    %c0_i32_1 = arith.constant 0 : i32
    return %c0_i32, %c0_i32_0 : i32, i32
  }
  func.func @transform_9(%arg0: i32) -> (i32, i32) {
    %c0_i32 = arith.constant 0 : i32
    %c0_i32_0 = arith.constant 0 : i32
    %c0_i32_1 = arith.constant 0 : i32
    return %c0_i32, %c0_i32_0 : i32, i32
  }
  func.func @transform_10(%arg0: i32) -> (i32, i32) {
    %c0_i32 = arith.constant 0 : i32
    %c0_i32_0 = arith.constant 0 : i32
    %c0_i32_1 = arith.constant 0 : i32
    return %c0_i32, %c0_i32_0 : i32, i32
  }
  func.func @transform_11(%arg0: i32) -> (i32, i32) {
    %c0_i32 = arith.constant 0 : i32
    %c0_i32_0 = arith.constant 0 : i32
    return %arg0, %c0_i32 : i32, i32
  }
}

module attributes {stable_mosaic.version = 11 : i64} {
  func.func @crossmapper_kernel(%arg0: i32, %arg1: memref<16x32xbf16, #tpu.memory_space<vmem>>, %arg2: memref<32x64xbf16, #tpu.memory_space<vmem>>, %arg3: memref<1x64xf32, #tpu.memory_space<vmem>>, %arg4: memref<64x256xbf16, #tpu.memory_space<vmem>>, %arg5: memref<1x256xf32, #tpu.memory_space<vmem>>, %arg6: memref<1x128xf32, #tpu.memory_space<vmem>>, %arg7: memref<1x128xf32, #tpu.memory_space<vmem>>, %arg8: memref<128x64xbf16, #tpu.memory_space<vmem>>, %arg9: memref<1x64xf32, #tpu.memory_space<vmem>>, %arg10: memref<64x128xbf16, #tpu.memory_space<vmem>>, %arg11: memref<1x128xf32, #tpu.memory_space<vmem>>, %arg12: memref<16x128xf32, #tpu.memory_space<vmem>>) attributes {dimension_semantics = [#tpu.dimension_semantics<parallel>], iteration_bounds = array<i64: 1>, scalar_prefetch = 0 : i64, scratch_operands = 0 : i64, tpu.core_type = #tpu.core_type<tc>, window_params = [{transform_indices = @transform_0, window_bounds = array<i64: 16, 32>}, {pipeline_mode = #tpu.pipeline_mode<synchronous>, transform_indices = @transform_1, window_bounds = array<i64: 32, 64>}, {pipeline_mode = #tpu.pipeline_mode<synchronous>, transform_indices = @transform_2, window_bounds = array<i64: 1, 64>}, {pipeline_mode = #tpu.pipeline_mode<synchronous>, transform_indices = @transform_3, window_bounds = array<i64: 64, 256>}, {pipeline_mode = #tpu.pipeline_mode<synchronous>, transform_indices = @transform_4, window_bounds = array<i64: 1, 256>}, {pipeline_mode = #tpu.pipeline_mode<synchronous>, transform_indices = @transform_5, window_bounds = array<i64: 1, 128>}, {pipeline_mode = #tpu.pipeline_mode<synchronous>, transform_indices = @transform_6, window_bounds = array<i64: 1, 128>}, {pipeline_mode = #tpu.pipeline_mode<synchronous>, transform_indices = @transform_7, window_bounds = array<i64: 128, 64>}, {pipeline_mode = #tpu.pipeline_mode<synchronous>, transform_indices = @transform_8, window_bounds = array<i64: 1, 64>}, {pipeline_mode = #tpu.pipeline_mode<synchronous>, transform_indices = @transform_9, window_bounds = array<i64: 64, 128>}, {pipeline_mode = #tpu.pipeline_mode<synchronous>, transform_indices = @transform_10, window_bounds = array<i64: 1, 128>}, {transform_indices = @transform_11, window_bounds = array<i64: 16, 128>}]} {
    %c0 = arith.constant 0 : index
    %c0_0 = arith.constant 0 : index
    %0 = vector.load %arg1[%c0, %c0_0] : memref<16x32xbf16, #tpu.memory_space<vmem>>, vector<16x32xbf16>
    %c0_1 = arith.constant 0 : index
    %c0_2 = arith.constant 0 : index
    %1 = vector.load %arg2[%c0_1, %c0_2] : memref<32x64xbf16, #tpu.memory_space<vmem>>, vector<32x64xbf16>
    %cst = arith.constant dense<0.000000e+00> : vector<16x64xf32>
    %2 = tpu.matmul %0, %1, %cst {dimension_numbers = #tpu.dot_dimension_numbers<[1], [0], [0], [1], [0, 0, 1, 1], [], []>} : vector<16x32xbf16>, vector<32x64xbf16>, vector<16x64xf32> -> vector<16x64xf32>
    %c0_3 = arith.constant 0 : index
    %c0_4 = arith.constant 0 : index
    %3 = vector.load %arg3[%c0_3, %c0_4] : memref<1x64xf32, #tpu.memory_space<vmem>>, vector<1x64xf32>
    %4 = vector.broadcast %3 : vector<1x64xf32> to vector<16x64xf32>
    %5 = arith.addf %2, %4 : vector<16x64xf32>
    %6 = arith.mulf %5, %5 : vector<16x64xf32>
    %7 = arith.mulf %5, %6 : vector<16x64xf32>
    %cst_5 = arith.constant 4.471500e-02 : f32
    %8 = vector.broadcast %cst_5 : f32 to vector<16x64xf32>
    %9 = arith.mulf %8, %7 : vector<16x64xf32>
    %10 = arith.addf %5, %9 : vector<16x64xf32>
    %cst_6 = arith.constant 0.797884583 : f32
    %11 = vector.broadcast %cst_6 : f32 to vector<16x64xf32>
    %12 = arith.mulf %11, %10 : vector<16x64xf32>
    %13 = math.tanh %12 : vector<16x64xf32>
    %cst_7 = arith.constant 1.000000e+00 : f32
    %14 = vector.broadcast %cst_7 : f32 to vector<16x64xf32>
    %15 = arith.addf %14, %13 : vector<16x64xf32>
    %cst_8 = arith.constant 5.000000e-01 : f32
    %16 = vector.broadcast %cst_8 : f32 to vector<16x64xf32>
    %17 = arith.mulf %16, %15 : vector<16x64xf32>
    %18 = arith.mulf %5, %17 : vector<16x64xf32>
    %19 = arith.truncf %18 : vector<16x64xf32> to vector<16x64xbf16>
    %c0_9 = arith.constant 0 : index
    %c0_10 = arith.constant 0 : index
    %20 = vector.load %arg4[%c0_9, %c0_10] : memref<64x256xbf16, #tpu.memory_space<vmem>>, vector<64x256xbf16>
    %cst_11 = arith.constant dense<0.000000e+00> : vector<16x256xf32>
    %21 = tpu.matmul %19, %20, %cst_11 {dimension_numbers = #tpu.dot_dimension_numbers<[1], [0], [0], [1], [0, 0, 1, 1], [], []>} : vector<16x64xbf16>, vector<64x256xbf16>, vector<16x256xf32> -> vector<16x256xf32>
    %c0_12 = arith.constant 0 : index
    %c0_13 = arith.constant 0 : index
    %22 = vector.load %arg5[%c0_12, %c0_13] : memref<1x256xf32, #tpu.memory_space<vmem>>, vector<1x256xf32>
    %23 = vector.broadcast %22 : vector<1x256xf32> to vector<16x256xf32>
    %24 = arith.addf %21, %23 : vector<16x256xf32>
    %25 = vector.extract_strided_slice %24 {offsets = [0, 0], sizes = [16, 128], strides = [1, 1]} : vector<16x256xf32> to vector<16x128xf32>
    %26 = vector.extract_strided_slice %24 {offsets = [0, 128], sizes = [16, 128], strides = [1, 1]} : vector<16x256xf32> to vector<16x128xf32>
    %cst_14 = arith.constant dense<0.000000e+00> : vector<16xf32>
    %27 = vector.multi_reduction <add>, %25, %cst_14 [1] : vector<16x128xf32> to vector<16xf32>
    %28 = vector.shape_cast %27 : vector<16xf32> to vector<16x1xf32>
    %cst_15 = arith.constant 1.280000e+02 : f32
    %29 = vector.broadcast %cst_15 : f32 to vector<16x1xf32>
    %30 = arith.divf %28, %29 : vector<16x1xf32>
    %31 = vector.broadcast %30 : vector<16x1xf32> to vector<16x128xf32>
    %32 = arith.subf %25, %31 : vector<16x128xf32>
    %33 = arith.mulf %32, %32 : vector<16x128xf32>
    %cst_16 = arith.constant dense<0.000000e+00> : vector<16xf32>
    %34 = vector.multi_reduction <add>, %33, %cst_16 [1] : vector<16x128xf32> to vector<16xf32>
    %35 = vector.shape_cast %34 : vector<16xf32> to vector<16x1xf32>
    %cst_17 = arith.constant 1.280000e+02 : f32
    %36 = vector.broadcast %cst_17 : f32 to vector<16x1xf32>
    %37 = arith.divf %35, %36 : vector<16x1xf32>
    %cst_18 = arith.constant 9.99999974E-6 : f32
    %38 = vector.broadcast %cst_18 : f32 to vector<16x1xf32>
    %39 = arith.addf %37, %38 : vector<16x1xf32>
    %40 = math.rsqrt %39 : vector<16x1xf32>
    %41 = vector.broadcast %40 : vector<16x1xf32> to vector<16x128xf32>
    %42 = arith.mulf %32, %41 : vector<16x128xf32>
    %c0_19 = arith.constant 0 : index
    %c0_20 = arith.constant 0 : index
    %43 = vector.load %arg6[%c0_19, %c0_20] : memref<1x128xf32, #tpu.memory_space<vmem>>, vector<1x128xf32>
    %44 = vector.broadcast %43 : vector<1x128xf32> to vector<16x128xf32>
    %45 = arith.mulf %42, %44 : vector<16x128xf32>
    %c0_21 = arith.constant 0 : index
    %c0_22 = arith.constant 0 : index
    %46 = vector.load %arg7[%c0_21, %c0_22] : memref<1x128xf32, #tpu.memory_space<vmem>>, vector<1x128xf32>
    %47 = vector.broadcast %46 : vector<1x128xf32> to vector<16x128xf32>
    %48 = arith.addf %45, %47 : vector<16x128xf32>
    %49 = arith.addf %48, %26 : vector<16x128xf32>
    %cst_23 = arith.constant 0.000000e+00 : f32
    %50 = vector.broadcast %cst_23 : f32 to vector<16x128xf32>
    %51 = arith.maximumf %49, %50 : vector<16x128xf32>
    %52 = arith.truncf %51 : vector<16x128xf32> to vector<16x128xbf16>
    %c0_24 = arith.constant 0 : index
    %c0_25 = arith.constant 0 : index
    %53 = vector.load %arg8[%c0_24, %c0_25] : memref<128x64xbf16, #tpu.memory_space<vmem>>, vector<128x64xbf16>
    %cst_26 = arith.constant dense<0.000000e+00> : vector<16x64xf32>
    %54 = tpu.matmul %52, %53, %cst_26 {dimension_numbers = #tpu.dot_dimension_numbers<[1], [0], [0], [1], [0, 0, 1, 1], [], []>} : vector<16x128xbf16>, vector<128x64xbf16>, vector<16x64xf32> -> vector<16x64xf32>
    %c0_27 = arith.constant 0 : index
    %c0_28 = arith.constant 0 : index
    %55 = vector.load %arg9[%c0_27, %c0_28] : memref<1x64xf32, #tpu.memory_space<vmem>>, vector<1x64xf32>
    %56 = vector.broadcast %55 : vector<1x64xf32> to vector<16x64xf32>
    %57 = arith.addf %54, %56 : vector<16x64xf32>
    %cst_29 = arith.constant 0.000000e+00 : f32
    %58 = vector.broadcast %cst_29 : f32 to vector<16x64xf32>
    %59 = arith.maximumf %57, %58 : vector<16x64xf32>
    %60 = arith.truncf %59 : vector<16x64xf32> to vector<16x64xbf16>
    %c0_30 = arith.constant 0 : index
    %c0_31 = arith.constant 0 : index
    %61 = vector.load %arg10[%c0_30, %c0_31] : memref<64x128xbf16, #tpu.memory_space<vmem>>, vector<64x128xbf16>
    %cst_32 = arith.constant dense<0.000000e+00> : vector<16x128xf32>
    %62 = tpu.matmul %60, %61, %cst_32 {dimension_numbers = #tpu.dot_dimension_numbers<[1], [0], [0], [1], [0, 0, 1, 1], [], []>} : vector<16x64xbf16>, vector<64x128xbf16>, vector<16x128xf32> -> vector<16x128xf32>
    %c0_33 = arith.constant 0 : index
    %c0_34 = arith.constant 0 : index
    %63 = vector.load %arg11[%c0_33, %c0_34] : memref<1x128xf32, #tpu.memory_space<vmem>>, vector<1x128xf32>
    %64 = vector.broadcast %63 : vector<1x128xf32> to vector<16x128xf32>
    %65 = arith.addf %62, %64 : vector<16x128xf32>
    %66 = arith.negf %65 : vector<16x128xf32>
    %67 = math.exp %66 : vector<16x128xf32>
    %cst_35 = arith.constant 1.000000e+00 : f32
    %68 = vector.broadcast %cst_35 : f32 to vector<16x128xf32>
    %69 = arith.addf %68, %67 : vector<16x128xf32>
    %70 = arith.divf %68, %69 : vector<16x128xf32>
    %c0_36 = arith.constant 0 : index
    %c0_37 = arith.constant 0 : index
    %71 = vector.load %arg12[%c0_36, %c0_37] : memref<16x128xf32, #tpu.memory_space<vmem>>, vector<16x128xf32>
    tpu.vector_store %arg12[%c0_36, %c0_37], %70 {strides = array<i32>} : memref<16x128xf32, #tpu.memory_space<vmem>>, vector<16x128xf32>,
    return
  }
  func.func @transform_0(%arg0: i32) -> (i32, i32) {
    %c0_i32 = arith.constant 0 : i32
    %c0_i32_0 = arith.constant 0 : i32
    return %arg0, %c0_i32 : i32, i32
  }
  func.func @transform_1(%arg0: i32) -> (i32, i32) {
    %c0_i32 = arith.constant 0 : i32
    %c0_i32_0 = arith.constant 0 : i32
    %c0_i32_1 = arith.constant 0 : i32
    return %c0_i32, %c0_i32_0 : i32, i32
  }
  func.func @transform_2(%arg0: i32) -> (i32, i32) {
    %c0_i32 = arith.constant 0 : i32
    %c0_i32_0 = arith.constant 0 : i32
    %c0_i32_1 = arith.constant 0 : i32
    return %c0_i32, %c0_i32_0 : i32, i32
  }
  func.func @transform_3(%arg0: i32) -> (i32, i32) {
    %c0_i32 = arith.constant 0 : i32
    %c0_i32_0 = arith.constant 0 : i32
    %c0_i32_1 = arith.constant 0 : i32
    return %c0_i32, %c0_i32_0 : i32, i32
  }
  func.func @transform_4(%arg0: i32) -> (i32, i32) {
    %c0_i32 = arith.constant 0 : i32
    %c0_i32_0 = arith.constant 0 : i32
    %c0_i32_1 = arith.constant 0 : i32
    return %c0_i32, %c0_i32_0 : i32, i32
  }
  func.func @transform_5(%arg0: i32) -> (i32, i32) {
    %c0_i32 = arith.constant 0 : i32
    %c0_i32_0 = arith.constant 0 : i32
    %c0_i32_1 = arith.constant 0 : i32
    return %c0_i32, %c0_i32_0 : i32, i32
  }
  func.func @transform_6(%arg0: i32) -> (i32, i32) {
    %c0_i32 = arith.constant 0 : i32
    %c0_i32_0 = arith.constant 0 : i32
    %c0_i32_1 = arith.constant 0 : i32
    return %c0_i32, %c0_i32_0 : i32, i32
  }
  func.func @transform_7(%arg0: i32) -> (i32, i32) {
    %c0_i32 = arith.constant 0 : i32
    %c0_i32_0 = arith.constant 0 : i32
    %c0_i32_1 = arith.constant 0 : i32
    return %c0_i32, %c0_i32_0 : i32, i32
  }
  func.func @transform_8(%arg0: i32) -> (i32, i32) {
    %c0_i32 = arith.constant 0 : i32
    %c0_i32_0 = arith.constant 0 : i32
    %c0_i32_1 = arith.constant 0 : i32
    return %c0_i32, %c0_i32_0 : i32, i32
  }
  func.func @transform_9(%arg0: i32) -> (i32, i32) {
    %c0_i32 = arith.constant 0 : i32
    %c0_i32_0 = arith.constant 0 : i32
    %c0_i32_1 = arith.constant 0 : i32
    return %c0_i32, %c0_i32_0 : i32, i32
  }
  func.func @transform_10(%arg0: i32) -> (i32, i32) {
    %c0_i32 = arith.constant 0 : i32
    %c0_i32_0 = arith.constant 0 : i32
    %c0_i32_1 = arith.constant 0 : i32
    return %c0_i32, %c0_i32_0 : i32, i32
  }
  func.func @transform_11(%arg0: i32) -> (i32, i32) {
    %c0_i32 = arith.constant 0 : i32
    %c0_i32_0 = arith.constant 0 : i32
    return %arg0, %c0_i32 : i32, i32
  }
}

</mosaic_0001>

<bundles_post_ra>
// kernel: tpu_custom_call.1
= control target key start
LH: loop header
LB: loop body
LE: loop exit
PB: predicated region body
PF: predicated region fallthrough
CT: control target
= control target key end

     0   :  { %16 = vsyncpa [#allocation3], 0  ;;  %s933_s0 = inlined_call_operand.hbm [shape: bf16[16,32], index: 0, kind: input, shape index: {}]   ;;  %s934_s1 = inlined_call_operand.hbm [shape: bf16[32,64], index: 1, kind: input, shape index: {}]   ;;  %s935_s2 = inlined_call_operand.vmem [shape: f32[1,64], index: 2, kind: input, shape index: {}]   ;;  %s936_s3 = inlined_call_operand.vmem [shape: bf16[64,256], index: 3, kind: input, shape index: {}]   ;;  %s937_s4 = inlined_call_operand.vmem [shape: f32[1,256], index: 4, kind: input, shape index: {}]   ;;  %s938_s5 = inlined_call_operand.vmem [shape: f32[1,128], index: 5, kind: input, shape index: {}]   ;;  %s939_s6 = inlined_call_operand.vmem [shape: f32[1,128], index: 6, kind: input, shape index: {}]   ;;  %s940_s7 = inlined_call_operand.vmem [shape: bf16[128,64], index: 7, kind: input, shape index: {}]   ;;  %s941_s8 = inlined_call_operand.vmem [shape: f32[1,64], index: 8, kind: input, shape index: {}]   ;;  %s942_s9 = inlined_call_operand.vmem [shape: bf16[64,128], index: 9, kind: input, shape index: {}]   ;;  %s943_s10 = inlined_call_operand.vmem [shape: f32[1,128], index: 10, kind: input, shape index: {}]   ;;  %s944_s11 = inlined_call_operand.hbm [shape: f32[16,128], index: 11, kind: output, shape index: {}]  }
   0x1   :  { %17 = vsyncpa [#allocation6], 0 }
   0x2   :  { %18 = vsyncpa [#allocation4], 0  ;;  %s754_s17 = smov [#allocation2]  }
   0x3   :  { %s24_s18 = sshll.u32 %s754_s17, 4  ;;  %s25_s18 = int_to_ptr.vmem [resolvable:$true] %s24_s18 }
   0x4   :  { %s696_s19 = scalar_lea.vmem %s25_s18, 128  ;;  %p701_p1 = scmp.lt.s32.totalorder %s25_s18, %s25_s18 }
   0x5   :  { %p697_p0 = scmp.ne.s32.totalorder %s25_s18, %s696_s19  ;;  %p702_p2 = scmp.lt.s32.totalorder %s696_s19, %s696_s19 }
   0x7   :  { %p703_p3 = por %p702_p2, %p701_p1 }
   0x9   :  { %p704_p4 = pnand %p703_p3, %p697_p0 }
   0xb   :  { %707 = shalt.err (!%p704_p4)
}
   0xc   :  { %s755_s20 = smov 64   ;;  %s756_s21 = smov 4  }
   0xd   :  { %30 = dma.hbm_to_vmem [thread:$0]  %s933_s0, 128, %s25_s18, [#allocation3], %s755_s20, %s755_s20, %s756_s21  }
   0xe   :  { %s757_s24 = smov [#allocation5]  }
   0xf   :  { %s36_s25 = sshll.u32 %s757_s24, 4  ;;  %s37_s25 = int_to_ptr.vmem [resolvable:$true] %s36_s25 }
  0x10   :  { %s716_s26 = scalar_lea.vmem %s37_s25, 256  ;;  %p721_p6 = scmp.lt.s32.totalorder %s37_s25, %s37_s25 }
  0x11   :  { %p717_p5 = scmp.ne.s32.totalorder %s37_s25, %s716_s26  ;;  %p722_p7 = scmp.lt.s32.totalorder %s716_s26, %s716_s26 }
  0x13   :  { %p723_p8 = por %p722_p7, %p721_p6 }
  0x15   :  { %p724_p9 = pnand %p723_p8, %p717_p5 }
  0x17   :  { %727 = shalt.err (!%p724_p9)
}
  0x18   :  { %42 = dma.hbm_to_vmem [thread:$0]  %s934_s1, 256, %s37_s25, [#allocation6], %s755_s20, %s755_s20, %s756_s21  }
  0x19   :  { %748 = dma.done.wait [#allocation3], 128  }
  0x1a   :  { %749 = vsyncadd [#allocation3], 4294967168 }
  0x1b   :  { %750 = dma.done.wait [#allocation6], 256  }
  0x1c   :  { %751 = vsyncadd [#allocation6], 4294967040  ;;  %v758_v0 = vmov 0.0   ;;  %vm759_vm0 = vmmov 0   ;;  %v645_v1 = vld [vmem:[#allocation5 + $0x8] sm:$0xff]   ;;  %v646_v2 = vld [vmem:[#allocation5] sm:$0xff]   ;;  %v172_v39 = vlaneseq }
  0x1d   :  { %595 = vmatprep.subr.bf16.mxu0 %v758_v0  ;;  %599 = vmatprep.mubr.msk.bf16.mxu0 %vm759_vm0, %v758_v0  ;;  %v647_v3 = vld [vmem:[#allocation2] sm:$0xff]   ;;  %vm98_vm1 = vcmask 261120   ;;  %v648_v4 = vld [vmem:[%s936_s3 + $0x34] ss:$8 sps:$4 sm:$0xff]   ;;  %v650_v5 = vld [vmem:[%s936_s3 + $0x30] ss:$8 sps:$4 sm:$0xff]  }
  0x1e   :  { %596 = vmatpush3.bf16.msra.mxu0 %v645_v1  ;;  %234 = vmatprep.subr.bf16.mxu1 %v648_v4  ;;  %v651_v6 = vld [vmem:[%s936_s3 + $0x24] ss:$8 sps:$4 sm:$0xff]   ;;  %v653_v7 = vld [vmem:[%s936_s3 + $0x20] ss:$8 sps:$4 sm:$0xff]   ;;  %v654_v8 = vld [vmem:[%s936_s3 + $0x14] ss:$8 sps:$4 sm:$0xff]  }
  0x1f   :  { %597 = vmatprep.subr.bf16.mxu0 %v758_v0  ;;  %235 = vmatpush1.bf16.msra.mxu1 %v650_v5  ;;  %v656_v9 = vld [vmem:[%s936_s3 + $0x10] ss:$8 sps:$4 sm:$0xff]   ;;  %v657_v10 = vld [vmem:[%s936_s3 + $0x4] ss:$8 sps:$4 sm:$0xff]   ;;  %v659_v11 = vld [vmem:[%s936_s3] ss:$8 sps:$4 sm:$0xff]  }
  0x20   :  { %236 = vmatprep.subr.bf16.mxu1 %v651_v6  ;;  %v760_v12 = vmov 0   ;;  %v545_v13 = vld [vmem:[%s935_s2] ss:$0 sm:$0xff]  ;;  %vm222_vm2 = vcmask 523264   ;;  %v173_v40 = vshrl.u32 %v172_v39, 7  ;;  %v660_v57 = vld [vmem:[%s940_s7 + $0x38] sm:$0xff]  }
  0x21   :  { %258 = vmatprep.mubr.bf16.mxu1 %v760_v12  ;;  %v170_v42 = vld [vmem:[%s937_s4] sm:$0x3]  ;;  %v661_v58 = vld [vmem:[%s940_s7 + $0x30] sm:$0xff]   ;;  %v662_v59 = vld [vmem:[%s940_s7 + $0x28] sm:$0xff]  }
  0x22   :  { %598 = vmatpush3.bf16.msra.mxu0 %v646_v2  ;;  %v174_v41 = vsub.s32 0, %v173_v40  ;;  %v663_v60 = vld [vmem:[%s940_s7 + $0x20] sm:$0xff]   ;;  %v664_v61 = vld [vmem:[%s940_s7 + $0x18] sm:$0xff]   ;;  %v665_v62 = vld [vmem:[%s940_s7 + $0x10] sm:$0xff]  }
  0x23   :  { %603 = vmatprep.subr.bf16.mxu0 %v758_v0  ;;  %237 = vmatpush1.bf16.msra.mxu1 %v653_v7  ;;  %v666_v63 = vld [vmem:[%s940_s7 + $0x8] sm:$0xff]   ;;  %v667_v1 = vld [vmem:[%s940_s7] sm:$0xff]   ;;  %v668_v2 = vld [vmem:[%s942_s9 + $0x18] sm:$0xff]  }
  0x24   :  { %238 = vmatprep.subr.bf16.mxu1 %v654_v8  ;;  %v175_v43 = vrot.slane %v170_v42, %v174_v41 }
  0x25   :  { %600 = vmatmul.mubr.msk.bf16.vlgmr.msra.gmra.mxu0 %vm98_vm1, %v647_v3 }
  0x26   :  { %619 = vmatprep.mubr.msk.bf16.mxu0 %vm759_vm0, %v758_v0  ;;  %604 = vmatpush3.bf16.msra.mxu0 %v660_v57 }
  0x27   :  { %239 = vmatpush1.bf16.msra.mxu1 %v656_v9  ;;  %605 = vmatprep.subr.bf16.mxu0 %v758_v0  ;;  %v178_v9 = vsub.s32 1, %v173_v40 }
  0x28   :  { %240 = vmatprep.subr.bf16.mxu1 %v657_v10 }
  0x2a   :  { %606 = vmatpush3.bf16.msra.mxu0 %v661_v58 }
  0x2b   :  { %241 = vmatpush1.bf16.msra.mxu1 %v659_v11  ;;  %607 = vmatprep.subr.bf16.mxu0 %v758_v0  ;;  %v559_v11 = vld [vmem:[%s938_s5] ss:$0 sm:$0xff] }
  0x2c   :  { %623 = vmatprep.subr.bf16.mxu1 %v758_v0 }
  0x2e   :  { %608 = vmatpush3.bf16.msra.mxu0 %v662_v59 }
  0x2f   :  { %609 = vmatprep.subr.bf16.mxu0 %v758_v0 }
  0x32   :  { %610 = vmatpush3.bf16.msra.mxu0 %v663_v60 }
  0x33   :  { %611 = vmatprep.subr.bf16.mxu0 %v758_v0 }
  0x36   :  { %612 = vmatpush3.bf16.msra.mxu0 %v664_v61 }
  0x37   :  { %613 = vmatprep.subr.bf16.mxu0 %v758_v0 }
  0x3a   :  { %614 = vmatpush3.bf16.msra.mxu0 %v665_v62 }
  0x3b   :  { %615 = vmatprep.subr.bf16.mxu0 %v758_v0 }
  0x3e   :  { %616 = vmatpush3.bf16.msra.mxu0 %v666_v63 }
  0x3f   :  { %617 = vmatprep.subr.bf16.mxu0 %v758_v0 }
  0x42   :  { %618 = vmatpush3.bf16.msra.mxu0 %v667_v1 }
  0xe5   :  { %v136_v14 = vpop.f32.mrf.mxu0 }
  0xe6   :  { %v137_v15 = vadd.f32 %v545_v13, %v136_v14  ;;  %v179_v14 = vrot.slane %v170_v42, %v178_v9 }
  0xe7   :  { %v601_v16 = vpop.f32.mrf.mxu0 }
  0xe8   :  { %v143_v17 = vmul.f32 %v137_v15, %v137_v15 }
  0xe9   :  { %v139_v18 = vpop.f32.mrf.mxu0 }
  0xea   :  { %v145_v19 = vmul.f32 %v143_v17, %v137_v15  ;;  %v140_v20 = vadd.f32 %v545_v13, %v139_v18  ;;  %v560_v13 = vld [vmem:[%s939_s6] ss:$0 sm:$0xff] }
  0xeb   :  { %v602_v21 = vpop.f32.mrf.mxu0 }
  0xec   :  { %v147_v22 = vmul.f32 0.044715, %v145_v19  ;;  %v144_v23 = vmul.f32 %v140_v20, %v140_v20 }
  0xee   :  { %v149_v24 = vadd.f32 %v147_v22, %v137_v15  ;;  %v146_v25 = vmul.f32 %v144_v23, %v140_v20 }
  0xf0   :  { %v151_v26 = vmul.f32 0.7978846, %v149_v24  ;;  %v148_v27 = vmul.f32 0.044715, %v146_v25 }
  0xf2   :  { %672 = vtanh.f32 %v151_v26  ;;  %v150_v28 = vadd.f32 %v148_v27, %v140_v20 }
  0xf4   :  { %v152_v29 = vmul.f32 0.7978846, %v150_v28 }
  0xf6   :  { %674 = vtanh.f32 %v152_v29  ;;  %v669_v29 = vld [vmem:[%s942_s9 + $0x10] sm:$0xff]  }
  0xff   :  { %v673_v30 = vpop.eup %672 }
 0x100   :  { %v155_v31 = vadd.f32 1.0, %v673_v30  ;;  %v670_v30 = vld [vmem:[%s942_s9 + $0x8] sm:$0xff]  }
 0x102   :  { %v157_v33 = vmul.f32 0.5, %v155_v31  ;;  %v671_v31 = vld [vmem:[%s942_s9] sm:$0xff]  }
 0x103   :  { %v675_v32 = vpop.eup %674 }
 0x104   :  { %v156_v34 = vadd.f32 1.0, %v675_v32  ;;  %v159_v36 = vmul.f32 %v157_v33, %v137_v15  ;;  %v561_v32 = vld [vmem:[%s941_s8] ss:$0 sm:$0xff]  ;;  %s761_s8 = smov [#allocation7]  }
 0x105   :  { %s532_s9 = sshll.u32 %s761_s8, 4  ;;  %s533_s9 = int_to_ptr.vmem [resolvable:$true] %s532_s9 }
 0x106   :  { %v158_v35 = vmul.f32 0.5, %v156_v34  ;;  %p733_p11 = scmp.lt.s32.totalorder %s533_s9, %s533_s9 }
 0x108   :  { %v160_v37 = vmul.f32 %v158_v35, %v140_v20 }
 0x10a   :  { %v161_v38 = vpack.c.bf16 %v160_v37, %v159_v36 }
 0x10c   :  { %558 = vmatmul.mubr.msk.bf16.vlgmr.msra.gmra.mxu1 %vm222_vm2, %v161_v38 }
 0x10d   :  { %631 = vmatprep.mubr.msk.bf16.mxu1 %vm759_vm0, %v758_v0  ;;  %624 = vmatpush3.bf16.msra.mxu1 %v668_v2 }
 0x10e   :  { %625 = vmatprep.subr.bf16.mxu1 %v758_v0 }
 0x111   :  { %626 = vmatpush3.bf16.msra.mxu1 %v669_v29 }
 0x112   :  { %627 = vmatprep.subr.bf16.mxu1 %v758_v0 }
 0x115   :  { %628 = vmatpush3.bf16.msra.mxu1 %v670_v30 }
 0x116   :  { %629 = vmatprep.subr.bf16.mxu1 %v758_v0  ;;  %v570_v0 = vld [vmem:[%s943_s10] ss:$0 sm:$0xff]  ;;  %s728_s10 = scalar_lea.vmem %s533_s9, 256 }
 0x117   :  { %p729_p10 = scmp.ne.s32.totalorder %s533_s9, %s728_s10  ;;  %p734_p12 = scmp.lt.s32.totalorder %s728_s10, %s728_s10 }
 0x119   :  { %630 = vmatpush3.bf16.msra.mxu1 %v671_v31  ;;  %p735_p13 = por %p734_p12, %p733_p11 }
 0x11b   :  { %p736_p0 = pnand %p735_p13, %p729_p10 }
 0x1cc   :  { %v260_v44 = vpop.f32.mrf.mxu1 }
 0x1cd   :  { %v261_v45 = vadd.f32 %v260_v44, %v175_v43 }
 0x1ce   :  { %v262_v46 = vpop.f32.mrf.mxu1 }
 0x1cf   :  { %269 = vadd.xlane.f32.xlu0 %v261_v45  ;;  %v263_v20 = vadd.f32 %v262_v46, %v179_v14 }
 0x1d0   :  { %v264_v47 = vpop.f32.mrf.mxu1 }
 0x1d1   :  { %v265_v48 = vadd.f32 %v264_v47, %v175_v43 }
 0x1d2   :  { %v266_v19 = vpop.f32.mrf.mxu1 }
 0x1d3   :  { %271 = vadd.xlane.f32.xlu0 %v265_v48  ;;  %v267_v22 = vadd.f32 %v266_v19, %v179_v14 }
 0x258   :  { %v270_v49 = vpop.xlane.xlu0 %269 }
 0x259   :  { %v274_v50 = vmul.f32 0.0078125, %v270_v49 }
 0x25b   :  { %v276_v51 = vsub.f32 %v261_v45, %v274_v50 }
 0x25c   :  { %v272_v52 = vpop.xlane.xlu0 %271 }
 0x25d   :  { %v275_v53 = vmul.f32 0.0078125, %v272_v52  ;;  %v278_v54 = vmul.f32 %v276_v51, %v276_v51 }
 0x25f   :  { %v277_v55 = vsub.f32 %v265_v48, %v275_v53  ;;  %280 = vadd.xlane.f32.xlu1 %v278_v54 }
 0x261   :  { %v279_v56 = vmul.f32 %v277_v55, %v277_v55 }
 0x263   :  { %282 = vadd.xlane.f32.xlu1 %v279_v56 }
 0x2e8   :  { %v281_v3 = vpop.xlane.xlu1 %280 }
 0x2e9   :  { %v284_v4 = vmul.f32 0.0078125, %v281_v3 }
 0x2eb   :  { %v286_v5 = vadd.f32 1e-05, %v284_v4 }
 0x2ec   :  { %v283_v6 = vpop.xlane.xlu1 %282 }
 0x2ed   :  { %676 = vrsqrt.f32 %v286_v5  ;;  %v285_v7 = vmul.f32 0.0078125, %v283_v6 }
 0x2ef   :  { %v287_v8 = vadd.f32 1e-05, %v285_v7 }
 0x2f1   :  { %678 = vrsqrt.f32 %v287_v8 }
 0x2fa   :  { %v677_v10 = vpop.eup %676 }
 0x2fb   :  { %v290_v12 = vmul.f32 %v677_v10, %v276_v51 }
 0x2fd   :  { %v299_v15 = vmul.f32 %v559_v11, %v290_v12 }
 0x2fe   :  { %v679_v16 = vpop.eup %678 }
 0x2ff   :  { %v291_v17 = vmul.f32 %v679_v16, %v277_v55  ;;  %v308_v18 = vadd.f32 %v560_v13, %v299_v15 }
 0x301   :  { %v300_v21 = vmul.f32 %v559_v11, %v291_v17  ;;  %v310_v24 = vadd.f32 %v308_v18, %v263_v20 }
 0x303   :  { %v309_v23 = vadd.f32 %v560_v13, %v300_v21  ;;  %v312_v26 = vmax.f32 %v310_v24, 0.0 }
 0x305   :  { %v311_v25 = vadd.f32 %v309_v23, %v267_v22 }
 0x307   :  { %v313_v27 = vmax.f32 %v311_v25, 0.0 }
 0x309   :  { %v314_v28 = vpack.c.bf16 %v313_v27, %v312_v26 }
 0x30b   :  { %620 = vmatmul.mubr.bf16.vlgmr.msra.gmra.mxu0 %v314_v28 }
 0x3cb   :  { %v420_v33 = vpop.f32.mrf.mxu0 }
 0x3cc   :  { %v421_v35 = vadd.f32 %v561_v32, %v420_v33 }
 0x3cd   :  { %v621_v34 = vpop.f32.mrf.mxu0 }
 0x3ce   :  { %v427_v39 = vmax.f32 %v421_v35, 0.0 }
 0x3cf   :  { %v423_v36 = vpop.f32.mrf.mxu0 }
 0x3d0   :  { %v424_v37 = vadd.f32 %v561_v32, %v423_v36 }
 0x3d1   :  { %v622_v38 = vpop.f32.mrf.mxu0 }
 0x3d2   :  { %v428_v40 = vmax.f32 %v424_v37, 0.0 }
 0x3d4   :  { %v429_v41 = vpack.c.bf16 %v428_v40, %v427_v39 }
 0x3d6   :  { %632 = vmatmul.mubr.msk.bf16.vlgmr.msra.gmra.mxu1 %vm222_vm2, %v429_v41 }
 0x496   :  { %v506_v42 = vpop.f32.mrf.mxu1 }
 0x497   :  { %v507_v43 = vadd.f32 %v570_v0, %v506_v42 }
 0x498   :  { %v633_v44 = vpop.f32.mrf.mxu1 }
 0x499   :  { %v576_v45 = vmul.f32 -1.442695, %v507_v43 }
 0x49a   :  { %v509_v46 = vpop.f32.mrf.mxu1 }
 0x49b   :  { %680 = vpow2.f32 %v576_v45  ;;  %v510_v47 = vadd.f32 %v570_v0, %v509_v46 }
 0x49c   :  { %v634_v48 = vpop.f32.mrf.mxu1 }
 0x49d   :  { %v577_v49 = vmul.f32 -1.442695, %v510_v47 }
 0x49f   :  { %682 = vpow2.f32 %v577_v49 }
 0x4a8   :  { %v681_v50 = vpop.eup %680 }
 0x4a9   :  { %v519_v51 = vadd.f32 1.0, %v681_v50 }
 0x4ab   :  { %684 = vrcp.f32 %v519_v51 }
 0x4ac   :  { %v683_v52 = vpop.eup %682 }
 0x4ad   :  { %v520_v53 = vadd.f32 1.0, %v683_v52 }
 0x4af   :  { %686 = vrcp.f32 %v520_v53 }
 0x4b8   :  { %v685_v54 = vpop.eup %684 }
 0x4b9   :  { %525 = vst [vmem:[#allocation7] sm:$0xff] %v685_v54 }
 0x4bc   :  { %v687_v55 = vpop.eup %686 }
 0x4bd   :  { %526 = vst [vmem:[#allocation7 + $0x8] sm:$0xff] %v687_v55 }
 0x4be   :  { %739 = shalt.err (!%p736_p0)
}
 0x4bf   :  { %s762_s1 = smov 128   ;;  %s763_s29 = smov 8  }
 0x4c0   :  { %538 = dma.vmem_to_hbm [thread:$0]  %s533_s9, 256, %s944_s11, [#allocation4], %s762_s1, %s762_s1, %s763_s29  }
 0x4c1   :  { %752 = dma.done.wait [#allocation4], 256  }
 0x4c2   :  { %753 = vsyncadd [#allocation4], 4294967040 }
 0x4c3   :  { %542 = vsyncpa [#allocation3], 1 }
 0x4c4   :  { %543 = vsyncpa [#allocation6], 1 }
 0x4c5   :  { %544 = vsyncpa [#allocation4], 1 }

// kernel: tpu_custom_call.1
= control target key start
LH: loop header
LB: loop body
LE: loop exit
PB: predicated region body
PF: predicated region fallthrough
CT: control target
= control target key end

     0   :  { %16 = vsyncpa [#allocation3], 0  ;;  %s933_s0 = inlined_call_operand.hbm [shape: bf16[16,32], index: 0, kind: input, shape index: {}]   ;;  %s934_s1 = inlined_call_operand.hbm [shape: bf16[32,64], index: 1, kind: input, shape index: {}]   ;;  %s935_s2 = inlined_call_operand.vmem [shape: f32[1,64], index: 2, kind: input, shape index: {}]   ;;  %s936_s3 = inlined_call_operand.vmem [shape: bf16[64,256], index: 3, kind: input, shape index: {}]   ;;  %s937_s4 = inlined_call_operand.vmem [shape: f32[1,256], index: 4, kind: input, shape index: {}]   ;;  %s938_s5 = inlined_call_operand.vmem [shape: f32[1,128], index: 5, kind: input, shape index: {}]   ;;  %s939_s6 = inlined_call_operand.vmem [shape: f32[1,128], index: 6, kind: input, shape index: {}]   ;;  %s940_s7 = inlined_call_operand.vmem [shape: bf16[128,64], index: 7, kind: input, shape index: {}]   ;;  %s941_s8 = inlined_call_operand.vmem [shape: f32[1,64], index: 8, kind: input, shape index: {}]   ;;  %s942_s9 = inlined_call_operand.vmem [shape: bf16[64,128], index: 9, kind: input, shape index: {}]   ;;  %s943_s10 = inlined_call_operand.vmem [shape: f32[1,128], index: 10, kind: input, shape index: {}]   ;;  %s944_s11 = inlined_call_operand.hbm [shape: f32[16,128], index: 11, kind: output, shape index: {}]  }
   0x1   :  { %17 = vsyncpa [#allocation6], 0 }
   0x2   :  { %18 = vsyncpa [#allocation4], 0  ;;  %s754_s17 = smov [#allocation2]  }
   0x3   :  { %s24_s18 = sshll.u32 %s754_s17, 4  ;;  %s25_s18 = int_to_ptr.vmem [resolvable:$true] %s24_s18 }
   0x4   :  { %s696_s19 = scalar_lea.vmem %s25_s18, 128  ;;  %p701_p1 = scmp.lt.s32.totalorder %s25_s18, %s25_s18 }
   0x5   :  { %p697_p0 = scmp.ne.s32.totalorder %s25_s18, %s696_s19  ;;  %p702_p2 = scmp.lt.s32.totalorder %s696_s19, %s696_s19 }
   0x7   :  { %p703_p3 = por %p702_p2, %p701_p1 }
   0x9   :  { %p704_p4 = pnand %p703_p3, %p697_p0 }
   0xb   :  { %707 = shalt.err (!%p704_p4)
}
   0xc   :  { %s755_s20 = smov 64   ;;  %s756_s21 = smov 4  }
   0xd   :  { %30 = dma.hbm_to_vmem [thread:$0]  %s933_s0, 128, %s25_s18, [#allocation3], %s755_s20, %s755_s20, %s756_s21  }
   0xe   :  { %s757_s24 = smov [#allocation5]  }
   0xf   :  { %s36_s25 = sshll.u32 %s757_s24, 4  ;;  %s37_s25 = int_to_ptr.vmem [resolvable:$true] %s36_s25 }
  0x10   :  { %s716_s26 = scalar_lea.vmem %s37_s25, 256  ;;  %p721_p6 = scmp.lt.s32.totalorder %s37_s25, %s37_s25 }
  0x11   :  { %p717_p5 = scmp.ne.s32.totalorder %s37_s25, %s716_s26  ;;  %p722_p7 = scmp.lt.s32.totalorder %s716_s26, %s716_s26 }
  0x13   :  { %p723_p8 = por %p722_p7, %p721_p6 }
  0x15   :  { %p724_p9 = pnand %p723_p8, %p717_p5 }
  0x17   :  { %727 = shalt.err (!%p724_p9)
}
  0x18   :  { %42 = dma.hbm_to_vmem [thread:$0]  %s934_s1, 256, %s37_s25, [#allocation6], %s755_s20, %s755_s20, %s756_s21  }
  0x19   :  { %748 = dma.done.wait [#allocation3], 128  }
  0x1a   :  { %749 = vsyncadd [#allocation3], 4294967168 }
  0x1b   :  { %750 = dma.done.wait [#allocation6], 256  }
  0x1c   :  { %751 = vsyncadd [#allocation6], 4294967040  ;;  %v758_v0 = vmov 0.0   ;;  %vm759_vm0 = vmmov 0   ;;  %v645_v1 = vld [vmem:[#allocation5 + $0x8] sm:$0xff]   ;;  %v646_v2 = vld [vmem:[#allocation5] sm:$0xff]   ;;  %v172_v39 = vlaneseq }
  0x1d   :  { %595 = vmatprep.subr.bf16.mxu0 %v758_v0  ;;  %599 = vmatprep.mubr.msk.bf16.mxu0 %vm759_vm0, %v758_v0  ;;  %v647_v3 = vld [vmem:[#allocation2] sm:$0xff]   ;;  %vm98_vm1 = vcmask 261120   ;;  %v648_v4 = vld [vmem:[%s936_s3 + $0x34] ss:$8 sps:$4 sm:$0xff]   ;;  %v650_v5 = vld [vmem:[%s936_s3 + $0x30] ss:$8 sps:$4 sm:$0xff]  }
  0x1e   :  { %596 = vmatpush3.bf16.msra.mxu0 %v645_v1  ;;  %234 = vmatprep.subr.bf16.mxu1 %v648_v4  ;;  %v651_v6 = vld [vmem:[%s936_s3 + $0x24] ss:$8 sps:$4 sm:$0xff]   ;;  %v653_v7 = vld [vmem:[%s936_s3 + $0x20] ss:$8 sps:$4 sm:$0xff]   ;;  %v654_v8 = vld [vmem:[%s936_s3 + $0x14] ss:$8 sps:$4 sm:$0xff]  }
  0x1f   :  { %597 = vmatprep.subr.bf16.mxu0 %v758_v0  ;;  %235 = vmatpush1.bf16.msra.mxu1 %v650_v5  ;;  %v656_v9 = vld [vmem:[%s936_s3 + $0x10] ss:$8 sps:$4 sm:$0xff]   ;;  %v657_v10 = vld [vmem:[%s936_s3 + $0x4] ss:$8 sps:$4 sm:$0xff]   ;;  %v659_v11 = vld [vmem:[%s936_s3] ss:$8 sps:$4 sm:$0xff]  }
  0x20   :  { %236 = vmatprep.subr.bf16.mxu1 %v651_v6  ;;  %v760_v12 = vmov 0   ;;  %v545_v13 = vld [vmem:[%s935_s2] ss:$0 sm:$0xff]  ;;  %vm222_vm2 = vcmask 523264   ;;  %v173_v40 = vshrl.u32 %v172_v39, 7  ;;  %v660_v57 = vld [vmem:[%s940_s7 + $0x38] sm:$0xff]  }
  0x21   :  { %258 = vmatprep.mubr.bf16.mxu1 %v760_v12  ;;  %v170_v42 = vld [vmem:[%s937_s4] sm:$0x3]  ;;  %v661_v58 = vld [vmem:[%s940_s7 + $0x30] sm:$0xff]   ;;  %v662_v59 = vld [vmem:[%s940_s7 + $0x28] sm:$0xff]  }
  0x22   :  { %598 = vmatpush3.bf16.msra.mxu0 %v646_v2  ;;  %v174_v41 = vsub.s32 0, %v173_v40  ;;  %v663_v60 = vld [vmem:[%s940_s7 + $0x20] sm:$0xff]   ;;  %v664_v61 = vld [vmem:[%s940_s7 + $0x18] sm:$0xff]   ;;  %v665_v62 = vld [vmem:[%s940_s7 + $0x10] sm:$0xff]  }
  0x23   :  { %603 = vmatprep.subr.bf16.mxu0 %v758_v0  ;;  %237 = vmatpush1.bf16.msra.mxu1 %v653_v7  ;;  %v666_v63 = vld [vmem:[%s940_s7 + $0x8] sm:$0xff]   ;;  %v667_v1 = vld [vmem:[%s940_s7] sm:$0xff]   ;;  %v668_v2 = vld [vmem:[%s942_s9 + $0x18] sm:$0xff]  }
  0x24   :  { %238 = vmatprep.subr.bf16.mxu1 %v654_v8  ;;  %v175_v43 = vrot.slane %v170_v42, %v174_v41 }
  0x25   :  { %600 = vmatmul.mubr.msk.bf16.vlgmr.msra.gmra.mxu0 %vm98_vm1, %v647_v3 }
  0x26   :  { %619 = vmatprep.mubr.msk.bf16.mxu0 %vm759_vm0, %v758_v0  ;;  %604 = vmatpush3.bf16.msra.mxu0 %v660_v57 }
  0x27   :  { %239 = vmatpush1.bf16.msra.mxu1 %v656_v9  ;;  %605 = vmatprep.subr.bf16.mxu0 %v758_v0  ;;  %v178_v9 = vsub.s32 1, %v173_v40 }
  0x28   :  { %240 = vmatprep.subr.bf16.mxu1 %v657_v10 }
  0x2a   :  { %606 = vmatpush3.bf16.msra.mxu0 %v661_v58 }
  0x2b   :  { %241 = vmatpush1.bf16.msra.mxu1 %v659_v11  ;;  %607 = vmatprep.subr.bf16.mxu0 %v758_v0  ;;  %v559_v11 = vld [vmem:[%s938_s5] ss:$0 sm:$0xff] }
  0x2c   :  { %623 = vmatprep.subr.bf16.mxu1 %v758_v0 }
  0x2e   :  { %608 = vmatpush3.bf16.msra.mxu0 %v662_v59 }
  0x2f   :  { %609 = vmatprep.subr.bf16.mxu0 %v758_v0 }
  0x32   :  { %610 = vmatpush3.bf16.msra.mxu0 %v663_v60 }
  0x33   :  { %611 = vmatprep.subr.bf16.mxu0 %v758_v0 }
  0x36   :  { %612 = vmatpush3.bf16.msra.mxu0 %v664_v61 }
  0x37   :  { %613 = vmatprep.subr.bf16.mxu0 %v758_v0 }
  0x3a   :  { %614 = vmatpush3.bf16.msra.mxu0 %v665_v62 }
  0x3b   :  { %615 = vmatprep.subr.bf16.mxu0 %v758_v0 }
  0x3e   :  { %616 = vmatpush3.bf16.msra.mxu0 %v666_v63 }
  0x3f   :  { %617 = vmatprep.subr.bf16.mxu0 %v758_v0 }
  0x42   :  { %618 = vmatpush3.bf16.msra.mxu0 %v667_v1 }
  0xe5   :  { %v136_v14 = vpop.f32.mrf.mxu0 }
  0xe6   :  { %v137_v15 = vadd.f32 %v545_v13, %v136_v14  ;;  %v179_v14 = vrot.slane %v170_v42, %v178_v9 }
  0xe7   :  { %v601_v16 = vpop.f32.mrf.mxu0 }
  0xe8   :  { %v143_v17 = vmul.f32 %v137_v15, %v137_v15 }
  0xe9   :  { %v139_v18 = vpop.f32.mrf.mxu0 }
  0xea   :  { %v145_v19 = vmul.f32 %v143_v17, %v137_v15  ;;  %v140_v20 = vadd.f32 %v545_v13, %v139_v18  ;;  %v560_v13 = vld [vmem:[%s939_s6] ss:$0 sm:$0xff] }
  0xeb   :  { %v602_v21 = vpop.f32.mrf.mxu0 }
  0xec   :  { %v147_v22 = vmul.f32 0.044715, %v145_v19  ;;  %v144_v23 = vmul.f32 %v140_v20, %v140_v20 }
  0xee   :  { %v149_v24 = vadd.f32 %v147_v22, %v137_v15  ;;  %v146_v25 = vmul.f32 %v144_v23, %v140_v20 }
  0xf0   :  { %v151_v26 = vmul.f32 0.7978846, %v149_v24  ;;  %v148_v27 = vmul.f32 0.044715, %v146_v25 }
  0xf2   :  { %672 = vtanh.f32 %v151_v26  ;;  %v150_v28 = vadd.f32 %v148_v27, %v140_v20 }
  0xf4   :  { %v152_v29 = vmul.f32 0.7978846, %v150_v28 }
  0xf6   :  { %674 = vtanh.f32 %v152_v29  ;;  %v669_v29 = vld [vmem:[%s942_s9 + $0x10] sm:$0xff]  }
  0xff   :  { %v673_v30 = vpop.eup %672 }
 0x100   :  { %v155_v31 = vadd.f32 1.0, %v673_v30  ;;  %v670_v30 = vld [vmem:[%s942_s9 + $0x8] sm:$0xff]  }
 0x102   :  { %v157_v33 = vmul.f32 0.5, %v155_v31  ;;  %v671_v31 = vld [vmem:[%s942_s9] sm:$0xff]  }
 0x103   :  { %v675_v32 = vpop.eup %674 }
 0x104   :  { %v156_v34 = vadd.f32 1.0, %v675_v32  ;;  %v159_v36 = vmul.f32 %v157_v33, %v137_v15  ;;  %v561_v32 = vld [vmem:[%s941_s8] ss:$0 sm:$0xff]  ;;  %s761_s8 = smov [#allocation7]  }
 0x105   :  { %s532_s9 = sshll.u32 %s761_s8, 4  ;;  %s533_s9 = int_to_ptr.vmem [resolvable:$true] %s532_s9 }
 0x106   :  { %v158_v35 = vmul.f32 0.5, %v156_v34  ;;  %p733_p11 = scmp.lt.s32.totalorder %s533_s9, %s533_s9 }
 0x108   :  { %v160_v37 = vmul.f32 %v158_v35, %v140_v20 }
 0x10a   :  { %v161_v38 = vpack.c.bf16 %v160_v37, %v159_v36 }
 0x10c   :  { %558 = vmatmul.mubr.msk.bf16.vlgmr.msra.gmra.mxu1 %vm222_vm2, %v161_v38 }
 0x10d   :  { %631 = vmatprep.mubr.msk.bf16.mxu1 %vm759_vm0, %v758_v0  ;;  %624 = vmatpush3.bf16.msra.mxu1 %v668_v2 }
 0x10e   :  { %625 = vmatprep.subr.bf16.mxu1 %v758_v0 }
 0x111   :  { %626 = vmatpush3.bf16.msra.mxu1 %v669_v29 }
 0x112   :  { %627 = vmatprep.subr.bf16.mxu1 %v758_v0 }
 0x115   :  { %628 = vmatpush3.bf16.msra.mxu1 %v670_v30 }
 0x116   :  { %629 = vmatprep.subr.bf16.mxu1 %v758_v0  ;;  %v570_v0 = vld [vmem:[%s943_s10] ss:$0 sm:$0xff]  ;;  %s728_s10 = scalar_lea.vmem %s533_s9, 256 }
 0x117   :  { %p729_p10 = scmp.ne.s32.totalorder %s533_s9, %s728_s10  ;;  %p734_p12 = scmp.lt.s32.totalorder %s728_s10, %s728_s10 }
 0x119   :  { %630 = vmatpush3.bf16.msra.mxu1 %v671_v31  ;;  %p735_p13 = por %p734_p12, %p733_p11 }
 0x11b   :  { %p736_p0 = pnand %p735_p13, %p729_p10 }
 0x1cc   :  { %v260_v44 = vpop.f32.mrf.mxu1 }
 0x1cd   :  { %v261_v45 = vadd.f32 %v260_v44, %v175_v43 }
 0x1ce   :  { %v262_v46 = vpop.f32.mrf.mxu1 }
 0x1cf   :  { %269 = vadd.xlane.f32.xlu0 %v261_v45  ;;  %v263_v20 = vadd.f32 %v262_v46, %v179_v14 }
 0x1d0   :  { %v264_v47 = vpop.f32.mrf.mxu1 }
 0x1d1   :  { %v265_v48 = vadd.f32 %v264_v47, %v175_v43 }
 0x1d2   :  { %v266_v19 = vpop.f32.mrf.mxu1 }
 0x1d3   :  { %271 = vadd.xlane.f32.xlu0 %v265_v48  ;;  %v267_v22 = vadd.f32 %v266_v19, %v179_v14 }
 0x258   :  { %v270_v49 = vpop.xlane.xlu0 %269 }
 0x259   :  { %v274_v50 = vmul.f32 0.0078125, %v270_v49 }
 0x25b   :  { %v276_v51 = vsub.f32 %v261_v45, %v274_v50 }
 0x25c   :  { %v272_v52 = vpop.xlane.xlu0 %271 }
 0x25d   :  { %v275_v53 = vmul.f32 0.0078125, %v272_v52  ;;  %v278_v54 = vmul.f32 %v276_v51, %v276_v51 }
 0x25f   :  { %v277_v55 = vsub.f32 %v265_v48, %v275_v53  ;;  %280 = vadd.xlane.f32.xlu1 %v278_v54 }
 0x261   :  { %v279_v56 = vmul.f32 %v277_v55, %v277_v55 }
 0x263   :  { %282 = vadd.xlane.f32.xlu1 %v279_v56 }
 0x2e8   :  { %v281_v3 = vpop.xlane.xlu1 %280 }
 0x2e9   :  { %v284_v4 = vmul.f32 0.0078125, %v281_v3 }
 0x2eb   :  { %v286_v5 = vadd.f32 1e-05, %v284_v4 }
 0x2ec   :  { %v283_v6 = vpop.xlane.xlu1 %282 }
 0x2ed   :  { %676 = vrsqrt.f32 %v286_v5  ;;  %v285_v7 = vmul.f32 0.0078125, %v283_v6 }
 0x2ef   :  { %v287_v8 = vadd.f32 1e-05, %v285_v7 }
 0x2f1   :  { %678 = vrsqrt.f32 %v287_v8 }
 0x2fa   :  { %v677_v10 = vpop.eup %676 }
 0x2fb   :  { %v290_v12 = vmul.f32 %v677_v10, %v276_v51 }
 0x2fd   :  { %v299_v15 = vmul.f32 %v559_v11, %v290_v12 }
 0x2fe   :  { %v679_v16 = vpop.eup %678 }
 0x2ff   :  { %v291_v17 = vmul.f32 %v679_v16, %v277_v55  ;;  %v308_v18 = vadd.f32 %v560_v13, %v299_v15 }
 0x301   :  { %v300_v21 = vmul.f32 %v559_v11, %v291_v17  ;;  %v310_v24 = vadd.f32 %v308_v18, %v263_v20 }
 0x303   :  { %v309_v23 = vadd.f32 %v560_v13, %v300_v21  ;;  %v312_v26 = vmax.f32 %v310_v24, 0.0 }
 0x305   :  { %v311_v25 = vadd.f32 %v309_v23, %v267_v22 }
 0x307   :  { %v313_v27 = vmax.f32 %v311_v25, 0.0 }
 0x309   :  { %v314_v28 = vpack.c.bf16 %v313_v27, %v312_v26 }
 0x30b   :  { %620 = vmatmul.mubr.bf16.vlgmr.msra.gmra.mxu0 %v314_v28 }
 0x3cb   :  { %v420_v33 = vpop.f32.mrf.mxu0 }
 0x3cc   :  { %v421_v35 = vadd.f32 %v561_v32, %v420_v33 }
 0x3cd   :  { %v621_v34 = vpop.f32.mrf.mxu0 }
 0x3ce   :  { %v427_v39 = vmax.f32 %v421_v35, 0.0 }
 0x3cf   :  { %v423_v36 = vpop.f32.mrf.mxu0 }
 0x3d0   :  { %v424_v37 = vadd.f32 %v561_v32, %v423_v36 }
 0x3d1   :  { %v622_v38 = vpop.f32.mrf.mxu0 }
 0x3d2   :  { %v428_v40 = vmax.f32 %v424_v37, 0.0 }
 0x3d4   :  { %v429_v41 = vpack.c.bf16 %v428_v40, %v427_v39 }
 0x3d6   :  { %632 = vmatmul.mubr.msk.bf16.vlgmr.msra.gmra.mxu1 %vm222_vm2, %v429_v41 }
 0x496   :  { %v506_v42 = vpop.f32.mrf.mxu1 }
 0x497   :  { %v507_v43 = vadd.f32 %v570_v0, %v506_v42 }
 0x498   :  { %v633_v44 = vpop.f32.mrf.mxu1 }
 0x499   :  { %v576_v45 = vmul.f32 -1.442695, %v507_v43 }
 0x49a   :  { %v509_v46 = vpop.f32.mrf.mxu1 }
 0x49b   :  { %680 = vpow2.f32 %v576_v45  ;;  %v510_v47 = vadd.f32 %v570_v0, %v509_v46 }
 0x49c   :  { %v634_v48 = vpop.f32.mrf.mxu1 }
 0x49d   :  { %v577_v49 = vmul.f32 -1.442695, %v510_v47 }
 0x49f   :  { %682 = vpow2.f32 %v577_v49 }
 0x4a8   :  { %v681_v50 = vpop.eup %680 }
 0x4a9   :  { %v519_v51 = vadd.f32 1.0, %v681_v50 }
 0x4ab   :  { %684 = vrcp.f32 %v519_v51 }
 0x4ac   :  { %v683_v52 = vpop.eup %682 }
 0x4ad   :  { %v520_v53 = vadd.f32 1.0, %v683_v52 }
 0x4af   :  { %686 = vrcp.f32 %v520_v53 }
 0x4b8   :  { %v685_v54 = vpop.eup %684 }
 0x4b9   :  { %525 = vst [vmem:[#allocation7] sm:$0xff] %v685_v54 }
 0x4bc   :  { %v687_v55 = vpop.eup %686 }
 0x4bd   :  { %526 = vst [vmem:[#allocation7 + $0x8] sm:$0xff] %v687_v55 }
 0x4be   :  { %739 = shalt.err (!%p736_p0)
}
 0x4bf   :  { %s762_s1 = smov 128   ;;  %s763_s29 = smov 8  }
 0x4c0   :  { %538 = dma.vmem_to_hbm [thread:$0]  %s533_s9, 256, %s944_s11, [#allocation4], %s762_s1, %s762_s1, %s763_s29  }
 0x4c1   :  { %752 = dma.done.wait [#allocation4], 256  }
 0x4c2   :  { %753 = vsyncadd [#allocation4], 4294967040 }
 0x4c3   :  { %542 = vsyncpa [#allocation3], 1 }
 0x4c4   :  { %543 = vsyncpa [#allocation6], 1 }
 0x4c5   :  { %544 = vsyncpa [#allocation4], 1 }

</bundles_post_ra>
